<compile_context>
chip_gen: v6e
topology: v6e:2x2x1
jax: 0.10.0
libtpu: 0.0.40
codegen_flags: <defaults>
</compile_context>

<pallas_src>
import jax
import jax.numpy as jnp
from jax.experimental import pallas as pl
from jax.experimental.pallas import tpu as pltpu


def _round_up(x, m):
    return (x + m - 1) // m * m


def _linear_kernel(x_ref, w_ref, b_ref, o_ref):
    # x_ref: (TM, Kp)  streamed activation tile
    # w_ref: (Kp, Np)  VMEM-resident (block-diagonal) weight
    # b_ref: (1,  Np)  VMEM-resident (tiled) bias, f32
    # o_ref: (TM, Np)  output tile
    acc = jnp.dot(x_ref[...], w_ref[...], preferred_element_type=jnp.float32)
    o_ref[...] = (acc + b_ref[...]).astype(o_ref.dtype)


def _tiled_linear(x2d, w_kn, b_row, out_dtype, tile_rows):
    """out[M, N] = x2d[M, K] @ w_kn[K, N] + b_row[1, N], streamed over M tiles."""
    M, K = x2d.shape
    N = w_kn.shape[1]

    # Row-tile selection: multiple of 8 (sublane), or the full extent (always legal).
    tm = max(8, _round_up(min(tile_rows, M), 8))
    if tm >= M:
        if M >= 1024:
            # Keep at least 2 grid steps so the "parallel" axis can split across
            # both TensorCores on v7x (mem-bound stream => ~2x).
            tm = _round_up(pl.cdiv(M, 2), 8)
        else:
            tm = M  # single full-dimension block
    grid_m = pl.cdiv(M, tm)

    return pl.pallas_call(
        _linear_kernel,
        out_shape=jax.ShapeDtypeStruct((M, N), out_dtype),
        grid_spec=pltpu.PrefetchScalarGridSpec(
            num_scalar_prefetch=0,
            grid=(grid_m,),
            in_specs=[
                # activations: stream row tiles (double-buffered by the pipeline)
                pl.BlockSpec((tm, K), lambda i: (i, 0)),
                # weight: constant index_map -> VMEM-resident across the grid
                pl.BlockSpec((K, N), lambda i: (0, 0)),
                # bias: constant index_map -> VMEM-resident across the grid
                pl.BlockSpec((1, N), lambda i: (0, 0)),
            ],
            out_specs=pl.BlockSpec((tm, N), lambda i: (i, 0)),
        ),
        compiler_params=pltpu.CompilerParams(
            # Rows are independent => parallel axis (v7x megacore sharding).
            dimension_semantics=("parallel",),
        ),
    )(x2d, w_kn, b_row)


def mmdvae_forward(inputs, weight, bias, *, tile_m=None, activation_dtype=None):
    """Equivalent to MMDVAE.forward == nn.Linear(input_dim, latent_dim)(inputs).

    inputs: (..., input_dim)
    weight: (latent_dim, input_dim)   (PyTorch convention)
    bias:   (latent_dim,)
    tile_m: rows per grid step of the 2D matmul actually run by the kernel
            (packed rows when the lane-dense repack applies).  Default: 2048
            packed / 4096 unpacked -- sized from the corrected VMEM budget.
    activation_dtype: optional streaming dtype for x / W (e.g. jnp.bfloat16) to
            halve HBM read traffic; accumulation stays f32, output keeps
            inputs.dtype.  Default None = exact f32 numerics.
    """
    in_dim = inputs.shape[-1]
    latent_dim = weight.shape[0]
    lead_shape = inputs.shape[:-1]
    out_dtype = inputs.dtype

    x2d = inputs.reshape(-1, in_dim)  # (M, K)
    M = x2d.shape[0]
    w_t = weight.T                    # (K, N)

    # Lane-dense pack factor: P rows per kernel row so P*N == 128 exactly.
    pack = 128 // latent_dim if (latent_dim <= 128 and 128 % latent_dim == 0) else 1
    if pack * in_dim > 2048:  # keep the resident block-diagonal weight small
        pack = 1

    if pack > 1:
        m_pad = _round_up(M, pack)
        if m_pad != M:
            x2d = jnp.pad(x2d, ((0, m_pad - M), (0, 0)))
        x_p = x2d.reshape(m_pad // pack, pack * in_dim)                 # (M/P, P*K)
        w_bd = jnp.kron(jnp.eye(pack, dtype=w_t.dtype), w_t)            # (P*K, P*N)
        b_row = jnp.tile(bias, pack).reshape(1, pack * latent_dim)      # (1, P*N)
        b_row = b_row.astype(jnp.float32)
        if activation_dtype is not None:
            x_p = x_p.astype(activation_dtype)
            w_bd = w_bd.astype(activation_dtype)
        tile_rows = tile_m if tile_m is not None else 2048
        out_p = _tiled_linear(x_p, w_bd, b_row, out_dtype, tile_rows)   # (M/P, P*N)
        out2d = out_p.reshape(m_pad, latent_dim)[:M]                    # free view + slice
    else:
        # Fallback: latent_dim does not evenly pack into 128 lanes.
        b_row = bias.reshape(1, latent_dim).astype(jnp.float32)
        x_s, w_s = x2d, w_t
        if activation_dtype is not None:
            x_s = x_s.astype(activation_dtype)
            w_s = w_s.astype(activation_dtype)
        tile_rows = tile_m if tile_m is not None else 4096
        out2d = _tiled_linear(x_s, w_s, b_row, out_dtype, tile_rows)

    return out2d.reshape(*lead_shape, latent_dim)


if __name__ == "__main__":
    # Small, deterministic example consistent with MMDVAE(input_dim=32, latent_dim=16)
    input_dim = 32
    latent_dim = 16
    batch, seq = 2, 8

    key = jax.random.PRNGKey(0)
    k_x, k_w, k_b, k_x2 = jax.random.split(key, 4)

    inputs = jax.random.normal(k_x, (batch, seq, input_dim), dtype=jnp.float32)
    # Deterministic parameter init (synthetic; matches nn.Linear parameter shapes).
    bound = 1.0 / (input_dim ** 0.5)
    weight = jax.random.uniform(k_w, (latent_dim, input_dim), minval=-bound, maxval=bound,
                                dtype=jnp.float32)
    bias = jax.random.uniform(k_b, (latent_dim,), minval=-bound, maxval=bound,
                              dtype=jnp.float32)
    ref = inputs @ weight.T + bias

    # --- 1) packed (lane-dense) path, single block ---
    out = jax.block_until_ready(mmdvae_forward(inputs, weight, bias))
    assert out.shape == (batch, seq, latent_dim)
    assert jnp.allclose(out, ref, atol=1e-5, rtol=1e-5)

    # --- 2) packed path, multi-step grid: padded M (300 -> 304) + partial edge block ---
    inputs2 = jax.random.normal(k_x2, (3, 100, input_dim), dtype=jnp.float32)  # M=300
    out2 = jax.block_until_ready(mmdvae_forward(inputs2, weight, bias, tile_m=16))
    ref2 = inputs2 @ weight.T + bias
    assert out2.shape == (3, 100, latent_dim)
    assert jnp.allclose(out2, ref2, atol=1e-5, rtol=1e-5)

    # --- 3) bf16 activation-streaming path (halves HBM reads; f32 accumulation) ---
    out3 = jax.block_until_ready(
        mmdvae_forward(inputs, weight, bias, activation_dtype=jnp.bfloat16))
    assert jnp.allclose(out3, ref, atol=5e-2, rtol=5e-2)

    # --- 4) fallback (unpacked) path: latent_dim that does not divide 128 ---
    latent_dim4 = 24
    k_w4, k_b4 = jax.random.split(jax.random.PRNGKey(1))
    weight4 = jax.random.uniform(k_w4, (latent_dim4, input_dim), minval=-bound, maxval=bound,
                                 dtype=jnp.float32)
    bias4 = jax.random.uniform(k_b4, (latent_dim4,), minval=-bound, maxval=bound,
                               dtype=jnp.float32)
    out4 = jax.block_until_ready(mmdvae_forward(inputs, weight4, bias4))
    ref4 = inputs @ weight4.T + bias4
    assert out4.shape == (batch, seq, latent_dim4)
    assert jnp.allclose(out4, ref4, atol=1e-5, rtol=1e-5)

    print("KERNEL_OK")
</pallas_src>

<mosaic_0001>
module attributes {stable_mosaic.version = 11 : i64} {
  func.func @_linear_kernel(%arg0: i32, %arg1: memref<2x256xf32, #tpu.memory_space<vmem>>, %arg2: memref<256x128xf32, #tpu.memory_space<vmem>>, %arg3: memref<1x128xf32, #tpu.memory_space<vmem>>, %arg4: memref<2x128xf32, #tpu.memory_space<vmem>>) attributes {dimension_semantics = [#tpu.dimension_semantics<parallel>], iteration_bounds = array<i64: 1>, scalar_prefetch = 0 : i64, scratch_operands = 0 : i64, tpu.core_type = #tpu.core_type<tc>, window_params = [{transform_indices = @transform_0, window_bounds = array<i64: 2, 256>}, {pipeline_mode = #tpu.pipeline_mode<synchronous>, transform_indices = @transform_1, window_bounds = array<i64: 256, 128>}, {pipeline_mode = #tpu.pipeline_mode<synchronous>, transform_indices = @transform_2, window_bounds = array<i64: 1, 128>}, {transform_indices = @transform_3, window_bounds = array<i64: 2, 128>}]} {
    %c0 = arith.constant 0 : index
    %c0_0 = arith.constant 0 : index
    %0 = vector.load %arg1[%c0, %c0_0] : memref<2x256xf32, #tpu.memory_space<vmem>>, vector<2x256xf32>
    %c0_1 = arith.constant 0 : index
    %c0_2 = arith.constant 0 : index
    %1 = vector.load %arg2[%c0_1, %c0_2] : memref<256x128xf32, #tpu.memory_space<vmem>>, vector<256x128xf32>
    %cst = arith.constant dense<0.000000e+00> : vector<2x128xf32>
    %2 = tpu.matmul %0, %1, %cst {dimension_numbers = #tpu.dot_dimension_numbers<[1], [0], [0], [1], [0, 0, 1, 1], [], []>} : vector<2x256xf32>, vector<256x128xf32>, vector<2x128xf32> -> vector<2x128xf32>
    %c0_3 = arith.constant 0 : index
    %c0_4 = arith.constant 0 : index
    %3 = vector.load %arg3[%c0_3, %c0_4] : memref<1x128xf32, #tpu.memory_space<vmem>>, vector<1x128xf32>
    %4 = vector.broadcast %3 : vector<1x128xf32> to vector<2x128xf32>
    %5 = arith.addf %2, %4 : vector<2x128xf32>
    %c0_5 = arith.constant 0 : index
    %c0_6 = arith.constant 0 : index
    %6 = vector.load %arg4[%c0_5, %c0_6] : memref<2x128xf32, #tpu.memory_space<vmem>>, vector<2x128xf32>
    tpu.vector_store %arg4[%c0_5, %c0_6], %5 {strides = array<i32>} : memref<2x128xf32, #tpu.memory_space<vmem>>, vector<2x128xf32>,
    return
  }
  func.func @transform_0(%arg0: i32) -> (i32, i32) {
    %c0_i32 = arith.constant 0 : i32
    %c0_i32_0 = arith.constant 0 : i32
    return %arg0, %c0_i32 : i32, i32
  }
  func.func @transform_1(%arg0: i32) -> (i32, i32) {
    %c0_i32 = arith.constant 0 : i32
    %c0_i32_0 = arith.constant 0 : i32
    %c0_i32_1 = arith.constant 0 : i32
    return %c0_i32, %c0_i32_0 : i32, i32
  }
  func.func @transform_2(%arg0: i32) -> (i32, i32) {
    %c0_i32 = arith.constant 0 : i32
    %c0_i32_0 = arith.constant 0 : i32
    %c0_i32_1 = arith.constant 0 : i32
    return %c0_i32, %c0_i32_0 : i32, i32
  }
  func.func @transform_3(%arg0: i32) -> (i32, i32) {
    %c0_i32 = arith.constant 0 : i32
    %c0_i32_0 = arith.constant 0 : i32
    return %arg0, %c0_i32 : i32, i32
  }
}

</mosaic_0001>

<bundles_post_ra>
// kernel: tpu_custom_call.1
= control target key start
LH: loop header
LB: loop body
LE: loop exit
PB: predicated region body
PF: predicated region fallthrough
CT: control target
= control target key end

     0   :  { %8 = vsyncpa [#allocation3], 0  ;;  %s324_s0 = inlined_call_operand.hbm [shape: f32[2,256], index: 0, kind: input, shape index: {}]   ;;  %s325_s1 = inlined_call_operand.hbm [shape: f32[256,128], index: 1, kind: input, shape index: {}]   ;;  %s326_s2 = inlined_call_operand.vmem [shape: f32[1,128], index: 2, kind: input, shape index: {}]   ;;  %s327_s3 = inlined_call_operand.hbm [shape: f32[2,128], index: 3, kind: output, shape index: {}]  }
   0x1   :  { %9 = vsyncpa [#allocation6], 0 }
   0x2   :  { %10 = vsyncpa [#allocation4], 0  ;;  %s287_s12 = smov [#allocation2]   ;;  %s288_s14 = smov [#allocation5]  }
   0x3   :  { %s17_s13 = sshll.u32 %s287_s12, 4  ;;  %s26_s15 = sshll.u32 %s288_s14, 4  ;;  %s18_s13 = int_to_ptr.vmem [resolvable:$true] %s17_s13  ;;  %s27_s15 = int_to_ptr.vmem [resolvable:$true] %s26_s15 }
   0x4   :  { %s229_s16 = scalar_lea.vmem %s18_s13, 64  ;;  %p234_p1 = scmp.lt.s32.totalorder %s18_s13, %s18_s13 }
   0x5   :  { %p230_p0 = scmp.ne.s32.totalorder %s18_s13, %s229_s16  ;;  %p235_p2 = scmp.lt.s32.totalorder %s229_s16, %s229_s16 }
   0x7   :  { %p236_p3 = por %p235_p2, %p234_p1 }
   0x9   :  { %p237_p4 = pnand %p236_p3, %p230_p0 }
   0xb   :  { %240 = shalt.err (!%p237_p4)
}
   0xc   :  { %20 = dma.hbm_to_vmem [thread:$0]  %s324_s0, 64, %s18_s13, [#allocation3]  }
   0xd   :  { %s249_s19 = scalar_lea.vmem %s27_s15, 4096  ;;  %p254_p6 = scmp.lt.s32.totalorder %s27_s15, %s27_s15 }
   0xe   :  { %p250_p5 = scmp.ne.s32.totalorder %s27_s15, %s249_s19  ;;  %p255_p7 = scmp.lt.s32.totalorder %s249_s19, %s249_s19 }
  0x10   :  { %p256_p8 = por %p255_p7, %p254_p6 }
  0x12   :  { %p257_p9 = pnand %p256_p8, %p250_p5 }
  0x14   :  { %260 = shalt.err (!%p257_p9)
}
  0x15   :  { %s289_s20 = smov 128   ;;  %s290_s21 = smov 8  }
  0x16   :  { %32 = dma.hbm_to_vmem [thread:$0]  %s325_s1, 4096, %s27_s15, [#allocation6], %s289_s20, %s289_s20, %s290_s21  }
  0x17   :  { %281 = dma.done.wait [#allocation3], 64  }
  0x18   :  { %282 = vsyncadd [#allocation3], 4294967232 }
  0x19   :  { %283 = dma.done.wait [#allocation6], 4096  }
  0x1a   :  { %284 = vsyncadd [#allocation6], 4294963200  ;;  %v73_v0 = vld [vmem:[#allocation5 + $0xf8] sm:$0xff]  ;;  %v72_v2 = vld [vmem:[#allocation5 + $0xf0] sm:$0xff]  ;;  %s291_s24 = smov [#allocation7]  }
  0x1b   :  { %v57_v1 = vld [vmem:[#allocation5 + $0x78] sm:$0xff]  ;;  %181 = vmatprep.subr.mxu0 %v73_v0  ;;  %v56_v3 = vld [vmem:[#allocation5 + $0x70] sm:$0xff]  ;;  %v71_v4 = vld [vmem:[#allocation5 + $0xe8] sm:$0xff]  ;;  %s169_s25 = sshll.u32 %s291_s24, 4  ;;  %s170_s25 = int_to_ptr.vmem [resolvable:$true] %s169_s25 }
  0x1c   :  { %182 = vmatpush3.msra.mxu0 %v57_v1  ;;  %v55_v5 = vld [vmem:[#allocation5 + $0x68] sm:$0xff]  ;;  %v70_v6 = vld [vmem:[#allocation5 + $0xe0] sm:$0xff]  ;;  %v69_v8 = vld [vmem:[#allocation5 + $0xd8] sm:$0xff]  ;;  %s261_s26 = scalar_lea.vmem %s170_s25, 32  ;;  %p266_p11 = scmp.lt.s32.totalorder %s170_s25, %s170_s25 }
  0x1d   :  { %183 = vmatprep.subr.mxu0 %v72_v2  ;;  %v54_v7 = vld [vmem:[#allocation5 + $0x60] sm:$0xff]  ;;  %v53_v9 = vld [vmem:[#allocation5 + $0x58] sm:$0xff]  ;;  %v68_v10 = vld [vmem:[#allocation5 + $0xd0] sm:$0xff]  ;;  %p262_p10 = scmp.ne.s32.totalorder %s170_s25, %s261_s26  ;;  %p267_p12 = scmp.lt.s32.totalorder %s261_s26, %s261_s26 }
  0x1e   :  { %184 = vmatpush3.msra.mxu0 %v56_v3  ;;  %v52_v11 = vld [vmem:[#allocation5 + $0x50] sm:$0xff]  ;;  %v67_v12 = vld [vmem:[#allocation5 + $0xc8] sm:$0xff]  ;;  %v180_v13 = vld.sshfl [vmem:[#allocation2] sm:$0x33 pattern:$0x76325410] }
  0x1f   :  { %185 = vmatprep.subr.mxu0 %v71_v4  ;;  %v51_v14 = vld [vmem:[#allocation5 + $0x48] sm:$0xff]  ;;  %v89_v15 = vcombine.high %v180_v13, %v180_v13  ;;  %v66_v16 = vld [vmem:[#allocation5 + $0xc0] sm:$0xff]  ;;  %v65_v18 = vld [vmem:[#allocation5 + $0xb8] sm:$0xff]  ;;  %p268_p13 = por %p267_p12, %p266_p11 }
  0x20   :  { %186 = vmatpush3.msra.mxu0 %v55_v5  ;;  %v50_v17 = vld [vmem:[#allocation5 + $0x40] sm:$0xff]  ;;  %v49_v19 = vld [vmem:[#allocation5 + $0x38] sm:$0xff]  ;;  %v64_v20 = vld [vmem:[#allocation5 + $0xb0] sm:$0xff] }
  0x21   :  { %187 = vmatprep.subr.mxu0 %v70_v6  ;;  %156 = vmatprep.mubr.f32.mxu0 %v89_v15  ;;  %v48_v21 = vld [vmem:[#allocation5 + $0x30] sm:$0xff]  ;;  %v63_v22 = vld [vmem:[#allocation5 + $0xa8] sm:$0xff]  ;;  %v62_v24 = vld [vmem:[#allocation5 + $0xa0] sm:$0xff]  ;;  %p269_p0 = pnand %p268_p13, %p262_p10 }
  0x22   :  { %188 = vmatpush3.msra.mxu0 %v54_v7  ;;  %v47_v23 = vld [vmem:[#allocation5 + $0x28] sm:$0xff]  ;;  %v46_v25 = vld [vmem:[#allocation5 + $0x20] sm:$0xff]  ;;  %v61_v26 = vld [vmem:[#allocation5 + $0x98] sm:$0xff] }
  0x23   :  { %189 = vmatprep.subr.mxu0 %v69_v8  ;;  %v45_v27 = vld [vmem:[#allocation5 + $0x18] sm:$0xff]  ;;  %v60_v28 = vld [vmem:[#allocation5 + $0x90] sm:$0xff]  ;;  %v59_v30 = vld [vmem:[#allocation5 + $0x88] sm:$0xff] }
  0x24   :  { %190 = vmatpush3.msra.mxu0 %v53_v9  ;;  %v44_v29 = vld [vmem:[#allocation5 + $0x10] sm:$0xff]  ;;  %v43_v31 = vld [vmem:[#allocation5 + $0x8] sm:$0xff]  ;;  %v58_v32 = vld [vmem:[#allocation5 + $0x80] sm:$0xff] }
  0x25   :  { %191 = vmatprep.subr.mxu0 %v68_v10  ;;  %v42_v33 = vld [vmem:[#allocation5] sm:$0xff]  ;;  %v179_v35 = vld [vmem:[%s326_s2] ss:$0 sm:$0xff] }
  0x26   :  { %192 = vmatpush3.msra.mxu0 %v52_v11 }
  0x27   :  { %193 = vmatprep.subr.mxu0 %v67_v12 }
  0x28   :  { %194 = vmatpush3.msra.mxu0 %v51_v14 }
  0x29   :  { %195 = vmatprep.subr.mxu0 %v66_v16 }
  0x2a   :  { %196 = vmatpush3.msra.mxu0 %v50_v17 }
  0x2b   :  { %197 = vmatprep.subr.mxu0 %v65_v18 }
  0x2c   :  { %198 = vmatpush3.msra.mxu0 %v49_v19 }
  0x2d   :  { %199 = vmatprep.subr.mxu0 %v64_v20 }
  0x2e   :  { %200 = vmatpush3.msra.mxu0 %v48_v21 }
  0x2f   :  { %201 = vmatprep.subr.mxu0 %v63_v22 }
  0x30   :  { %202 = vmatpush3.msra.mxu0 %v47_v23 }
  0x31   :  { %203 = vmatprep.subr.mxu0 %v62_v24 }
  0x32   :  { %204 = vmatpush3.msra.mxu0 %v46_v25 }
  0x33   :  { %205 = vmatprep.subr.mxu0 %v61_v26 }
  0x34   :  { %206 = vmatpush3.msra.mxu0 %v45_v27 }
  0x35   :  { %207 = vmatprep.subr.mxu0 %v60_v28 }
  0x36   :  { %208 = vmatpush3.msra.mxu0 %v44_v29 }
  0x37   :  { %209 = vmatprep.subr.mxu0 %v59_v30 }
  0x38   :  { %210 = vmatpush3.msra.mxu0 %v43_v31 }
  0x39   :  { %211 = vmatprep.subr.mxu0 %v58_v32 }
  0x3a   :  { %212 = vmatpush3.msra.mxu0 %v42_v33 }
  0x3b   :  { %157 = vmatmul.mubr.f32.vlgmr.msra.gmra.mxu0 %v180_v13 }
  0xfb   :  { %v213_v34 = vpop.f32.mrf.mxu0 }
  0xfd   :  { %v214_v36 = vpop.f32.mrf.mxu0 }
  0xfe   :  { %v215_v37 = vadd.f32 %v214_v36, %v213_v34 }
 0x100   :  { %v159_v38 = vadd.f32 %v215_v37, %v179_v35 }
 0x102   :  { %162 = vst [vmem:[#allocation7] sm:$0x3] %v159_v38 }
 0x103   :  { %272 = shalt.err (!%p269_p0)
}
 0x104   :  { %172 = dma.vmem_to_hbm [thread:$0]  %s170_s25, 32, %s327_s3, [#allocation4]  }
 0x105   :  { %285 = dma.done.wait [#allocation4], 32  }
 0x106   :  { %286 = vsyncadd [#allocation4], 4294967264 }
 0x107   :  { %176 = vsyncpa [#allocation3], 1 }
 0x108   :  { %177 = vsyncpa [#allocation6], 1 }
 0x109   :  { %178 = vsyncpa [#allocation4], 1 }

</bundles_post_ra>
